<compile_context>
chip_gen: v5e
topology: v5e:2x2
jax: 0.10.0
libtpu: 0.0.40
codegen_flags: <defaults>
</compile_context>

<pallas_src>
import numpy as np
import jax
import jax.numpy as jnp
from jax import lax
from jax.experimental import pallas as pl
from jax.experimental.pallas import tpu as pltpu

K_NEIGHBORS = 5  # sklearn n_neighbors=5 -> 4 real neighbours (self skipped)


def hypergraph_layer_kernel(x_ref, params_ref, out_ref):
    N, hid = x_ref.shape
    x = x_ref[...]  # (N, hid) float32

    # ---- exact brute-force kNN keys --------------------------------------------
    # key[i,j] = |x_j|^2 - 2<x_i,x_j>  (row-constant |x_i|^2 dropped: same per-row argmin)
    # -2 x x^T on the MXU, no transpose anywhere.
    gram_m2 = lax.dot_general(x * (-2.0), x, (((1,), (1,)), ((), ())),
                              preferred_element_type=jnp.float32)          # (N, N)
    # Column norms directly in (1,N) layout via a 1-row MXU matmul (no sq.T relayout).
    colnorm = lax.dot_general(jnp.ones((1, hid), jnp.float32), x * x,
                              (((1,), (1,)), ((), ())),
                              preferred_element_type=jnp.float32)          # (1, N)

    row_i = lax.broadcasted_iota(jnp.int32, (N, 1), 0)
    col_j = lax.broadcasted_iota(jnp.int32, (N, N), 1)
    not_diag = col_j != row_i
    inf = jnp.float32(jnp.inf)
    key = jnp.where(not_diag, colnorm + gram_m2, inf)                      # self excluded

    # ---- 4 serial exact argmin picks --------------------------------------------
    # Each pick: one XLU lane-reduce + compare + select.  Picked entries are marked
    # +inf; H is rebuilt from the inf-mask in a single pass afterwards (no per-pick
    # H accumulation / casts).  Exact keys -> matches reference except exact ties.
    def pick(_, k):
        sel = jnp.min(k, axis=1, keepdims=True)                            # (N, 1)
        return jnp.where(k == sel, inf, k)

    key = lax.fori_loop(0, K_NEIGHBORS - 1, pick, key, unroll=True)
    H = jnp.where((key == inf) & not_diag, 1.0, 0.0).astype(jnp.float32)   # (N, N)

    # ---- propagation matrix M = D^-1 H B^-1 H^T  (D == k-1 statically) ----------
    deg_e = jnp.sum(H, axis=0, keepdims=True)                              # (1, N)
    # fold the constant D^-1 = 1/(k-1) into B^-1 (saves one (N,N) scaling pass)
    binv = jnp.where(deg_e > 0, (1.0 / (K_NEIGHBORS - 1)) / deg_e, 0.0)    # zero-safe
    M = lax.dot_general(H * binv, H, (((1,), (1,)), ((), ())),
                        preferred_element_type=jnp.float32)                # (N, N)

    # ---- parameters: one packed VMEM input, static slice views ------------------
    w1t = params_ref[0:hid, :]                     # (hid, hid)  = W1^T
    w2t = params_ref[hid:2 * hid, :]               # (hid, hid)  = W2^T
    b1 = params_ref[2 * hid:2 * hid + 1, :]        # (1, hid)
    b2 = params_ref[2 * hid + 1:2 * hid + 2, :]    # (1, hid)
    alpha = params_ref[2 * hid + 2:2 * hid + 3, :]  # (1, hid) broadcast PReLU slope

    def prelu(v):
        return jnp.where(v >= 0, v, alpha * v)

    def hconv(feat, w_t, b):
        y = jnp.dot(feat, w_t, preferred_element_type=jnp.float32)         # X W^T
        return jnp.dot(M, y, preferred_element_type=jnp.float32) + b

    out1 = prelu(hconv(x, w1t, b1))
    out2 = hconv(out1, w2t, b2) + x
    out_ref[...] = prelu(out2).astype(out_ref.dtype)


def hypergraph_structural_layer_knn(x, w1, b1, w2, b2, prelu_alpha):
    """x: (N, hid) single graph or (B, N, hid) batch of independent graphs."""
    squeeze = x.ndim == 2
    if squeeze:
        x = x[None]
    B, N, hid = x.shape
    assert N >= K_NEIGHBORS, "need at least k-1 non-self candidates per node"
    assert w1.shape == (hid, hid) and w2.shape == (hid, hid)

    # Pack all tiny parameters into a single VMEM input (one DMA instead of five).
    params = jnp.concatenate(
        [
            jnp.asarray(w1, jnp.float32).T,                # rows [0, hid)
            jnp.asarray(w2, jnp.float32).T,                # rows [hid, 2*hid)
            jnp.asarray(b1, jnp.float32).reshape(1, hid),  # row 2*hid
            jnp.asarray(b2, jnp.float32).reshape(1, hid),  # row 2*hid+1
            jnp.full((1, hid), prelu_alpha, jnp.float32),  # row 2*hid+2
        ],
        axis=0,
    )  # (2*hid + 3, hid)

    out = pl.pallas_call(
        hypergraph_layer_kernel,
        out_shape=jax.ShapeDtypeStruct((B, N, hid), jnp.float32),
        grid=(B,),
        in_specs=[
            pl.BlockSpec((None, N, hid), lambda b: (b, 0, 0)),   # per-graph features
            pl.BlockSpec(params.shape, lambda b: (0, 0)),        # resident parameters
        ],
        out_specs=pl.BlockSpec((None, N, hid), lambda b: (b, 0, 0)),
        compiler_params=pltpu.CompilerParams(dimension_semantics=("parallel",)),
    )(jnp.asarray(x, jnp.float32), params)
    return out[0] if squeeze else out


def reference(x, w1, b1, w2, b2, alpha, k=K_NEIGHBORS):
    """Pure-JAX reference of the same semantics (single graph) for correctness check."""
    N = x.shape[0]
    d2 = jnp.sum((x[:, None, :] - x[None, :, :]) ** 2, axis=-1)
    d2 = d2.at[jnp.arange(N), jnp.arange(N)].set(jnp.inf)
    nbr = jax.lax.top_k(-d2, k - 1)[1]                                     # (N, k-1)
    H = jnp.zeros((N, N), jnp.float32).at[jnp.arange(N)[:, None], nbr].set(1.0)
    dn = H.sum(1)
    de = H.sum(0)
    Dinv = jnp.where(dn > 0, 1.0 / dn, 0.0)[:, None]
    Binv = jnp.where(de > 0, 1.0 / de, 0.0)[None, :]
    prelu = lambda v: jnp.where(v >= 0, v, alpha * v)

    def hconv(f, w, b):
        return Dinv * (H @ (Binv.T * (H.T @ (f @ w.T)))) + b

    o1 = prelu(hconv(x, w1, b1))
    return prelu(hconv(o1, w2, b2) + x)


if __name__ == "__main__":
    key = jax.random.PRNGKey(0)
    B, N, hidden_dim, n_heads = 4, 64, 32, 4
    out_ch = n_heads * hidden_dim // n_heads  # == hidden_dim

    k1, k2, k3, k4 = jax.random.split(key, 4)
    x = jax.random.normal(k1, (B, N, hidden_dim), jnp.float32)
    scale = 1.0 / np.sqrt(hidden_dim)
    w1 = jax.random.normal(k2, (out_ch, hidden_dim), jnp.float32) * scale
    w2 = jax.random.normal(k3, (out_ch, hidden_dim), jnp.float32) * scale
    b1 = jnp.zeros((out_ch,), jnp.float32)   # PyG HypergraphConv zero-inits bias
    b2 = jnp.zeros((out_ch,), jnp.float32)
    prelu_alpha = 0.25                       # nn.PReLU() default single parameter

    # edge_index is part of the torch interface but never read by the forward pass
    # (the hypergraph is rebuilt from x via kNN), so it is not passed to the kernel.
    edge_index = jax.random.randint(k4, (2, 128), 0, N)

    out = hypergraph_structural_layer_knn(x, w1, b1, w2, b2, prelu_alpha)
    out = jax.block_until_ready(out)
    assert out.shape == (B, N, hidden_dim)

    ref = jnp.stack([reference(x[b], w1, b1, w2, b2, prelu_alpha) for b in range(B)])
    np.testing.assert_allclose(np.asarray(out), np.asarray(ref), rtol=1e-4, atol=1e-4)

    print("KERNEL_OK")
</pallas_src>

<mosaic_0001>
module attributes {stable_mosaic.version = 11 : i64} {
  func.func @hypergraph_layer_kernel(%arg0: i32, %arg1: memref<1x64x32xf32, #tpu.memory_space<vmem>>, %arg2: memref<67x32xf32, #tpu.memory_space<vmem>>, %arg3: memref<1x64x32xf32, #tpu.memory_space<vmem>>) attributes {dimension_semantics = [#tpu.dimension_semantics<parallel>], iteration_bounds = array<i64: 4>, scalar_prefetch = 0 : i64, scratch_operands = 0 : i64, tpu.core_type = #tpu.core_type<tc>, window_params = [{transform_indices = @transform_0, window_bounds = array<i64: 1, 64, 32>}, {pipeline_mode = #tpu.pipeline_mode<synchronous>, transform_indices = @transform_1, window_bounds = array<i64: 67, 32>}, {transform_indices = @transform_2, window_bounds = array<i64: 1, 64, 32>}]} {
    %c0 = arith.constant 0 : index
    %c0_0 = arith.constant 0 : index
    %c0_1 = arith.constant 0 : index
    %0 = vector.load %arg1[%c0, %c0_0, %c0_1] : memref<1x64x32xf32, #tpu.memory_space<vmem>>, vector<1x64x32xf32>
    %1 = vector.shape_cast %0 : vector<1x64x32xf32> to vector<64x32xf32>
    %cst = arith.constant -2.000000e+00 : f32
    %2 = vector.broadcast %cst : f32 to vector<64x32xf32>
    %3 = arith.mulf %1, %2 : vector<64x32xf32>
    %cst_2 = arith.constant dense<0.000000e+00> : vector<64x64xf32>
    %4 = tpu.matmul %3, %1, %cst_2 {dimension_numbers = #tpu.dot_dimension_numbers<[1], [1], [0], [0], [0, 0, 1, 0], [], []>} : vector<64x32xf32>, vector<64x32xf32>, vector<64x64xf32> -> vector<64x64xf32>
    %cst_3 = arith.constant 1.000000e+00 : f32
    %5 = vector.broadcast %cst_3 : f32 to vector<1x32xf32>
    %6 = arith.mulf %1, %1 : vector<64x32xf32>
    %cst_4 = arith.constant dense<0.000000e+00> : vector<1x64xf32>
    %7 = tpu.matmul %5, %6, %cst_4 {dimension_numbers = #tpu.dot_dimension_numbers<[1], [1], [0], [0], [0, 0, 1, 0], [], []>} : vector<1x32xf32>, vector<64x32xf32>, vector<1x64xf32> -> vector<1x64xf32>
    %8 = tpu.iota {dimensions = array<i32: 0>} : vector<64x1xi32>
    %9 = tpu.iota {dimensions = array<i32: 1>} : vector<64x64xi32>
    %10 = vector.broadcast %8 : vector<64x1xi32> to vector<64x64xi32>
    %11 = arith.cmpi ne, %9, %10 : vector<64x64xi32>
    %12 = vector.broadcast %7 : vector<1x64xf32> to vector<64x64xf32>
    %13 = arith.addf %12, %4 : vector<64x64xf32>
    %cst_5 = arith.constant 0x7F800000 : f32
    %14 = vector.broadcast %cst_5 : f32 to vector<64x64xf32>
    %15 = arith.select %11, %13, %14 : vector<64x64xi1>, vector<64x64xf32>
    %cst_6 = arith.constant 0x7F800000 : f32
    %c0_i32 = arith.constant 0 : i32
    %cst_7 = arith.constant dense<0x7F800000> : vector<64xf32>
    %16 = vector.multi_reduction <minimumf>, %15, %cst_7 [1] : vector<64x64xf32> to vector<64xf32>
    %17 = vector.shape_cast %16 : vector<64xf32> to vector<64x1xf32>
    %18 = vector.broadcast %17 : vector<64x1xf32> to vector<64x64xf32>
    %19 = arith.cmpf oeq, %15, %18 : vector<64x64xf32>
    %20 = vector.broadcast %cst_6 : f32 to vector<64x64xf32>
    %21 = arith.select %19, %20, %15 : vector<64x64xi1>, vector<64x64xf32>
    %c1_i32 = arith.constant 1 : i32
    %cst_8 = arith.constant dense<0x7F800000> : vector<64xf32>
    %22 = vector.multi_reduction <minimumf>, %21, %cst_8 [1] : vector<64x64xf32> to vector<64xf32>
    %23 = vector.shape_cast %22 : vector<64xf32> to vector<64x1xf32>
    %24 = vector.broadcast %23 : vector<64x1xf32> to vector<64x64xf32>
    %25 = arith.cmpf oeq, %21, %24 : vector<64x64xf32>
    %26 = vector.broadcast %cst_6 : f32 to vector<64x64xf32>
    %27 = arith.select %25, %26, %21 : vector<64x64xi1>, vector<64x64xf32>
    %c2_i32 = arith.constant 2 : i32
    %cst_9 = arith.constant dense<0x7F800000> : vector<64xf32>
    %28 = vector.multi_reduction <minimumf>, %27, %cst_9 [1] : vector<64x64xf32> to vector<64xf32>
    %29 = vector.shape_cast %28 : vector<64xf32> to vector<64x1xf32>
    %30 = vector.broadcast %29 : vector<64x1xf32> to vector<64x64xf32>
    %31 = arith.cmpf oeq, %27, %30 : vector<64x64xf32>
    %32 = vector.broadcast %cst_6 : f32 to vector<64x64xf32>
    %33 = arith.select %31, %32, %27 : vector<64x64xi1>, vector<64x64xf32>
    %c3_i32 = arith.constant 3 : i32
    %cst_10 = arith.constant dense<0x7F800000> : vector<64xf32>
    %34 = vector.multi_reduction <minimumf>, %33, %cst_10 [1] : vector<64x64xf32> to vector<64xf32>
    %35 = vector.shape_cast %34 : vector<64xf32> to vector<64x1xf32>
    %36 = vector.broadcast %35 : vector<64x1xf32> to vector<64x64xf32>
    %37 = arith.cmpf oeq, %33, %36 : vector<64x64xf32>
    %38 = vector.broadcast %cst_6 : f32 to vector<64x64xf32>
    %39 = arith.select %37, %38, %33 : vector<64x64xi1>, vector<64x64xf32>
    %cst_11 = arith.constant 0x7F800000 : f32
    %40 = vector.broadcast %cst_11 : f32 to vector<64x64xf32>
    %41 = arith.cmpf oeq, %39, %40 : vector<64x64xf32>
    %42 = arith.andi %41, %11 : vector<64x64xi1>
    %cst_12 = arith.constant 1.000000e+00 : f32
    %cst_13 = arith.constant 0.000000e+00 : f32
    %43 = vector.broadcast %cst_12 : f32 to vector<64x64xf32>
    %44 = vector.broadcast %cst_13 : f32 to vector<64x64xf32>
    %45 = arith.select %42, %43, %44 : vector<64x64xi1>, vector<64x64xf32>
    %cst_14 = arith.constant dense<0.000000e+00> : vector<64xf32>
    %46 = vector.multi_reduction <add>, %45, %cst_14 [0] : vector<64x64xf32> to vector<64xf32>
    %47 = vector.shape_cast %46 : vector<64xf32> to vector<1x64xf32>
    %cst_15 = arith.constant 0.000000e+00 : f32
    %48 = vector.broadcast %cst_15 : f32 to vector<1x64xf32>
    %49 = arith.cmpf ogt, %47, %48 : vector<1x64xf32>
    %cst_16 = arith.constant 2.500000e-01 : f32
    %50 = vector.broadcast %cst_16 : f32 to vector<1x64xf32>
    %51 = arith.divf %50, %47 : vector<1x64xf32>
    %cst_17 = arith.constant 0.000000e+00 : f32
    %52 = vector.broadcast %cst_17 : f32 to vector<1x64xf32>
    %53 = arith.select %49, %51, %52 : vector<1x64xi1>, vector<1x64xf32>
    %54 = vector.broadcast %53 : vector<1x64xf32> to vector<64x64xf32>
    %55 = arith.mulf %45, %54 : vector<64x64xf32>
    %cst_18 = arith.constant dense<0.000000e+00> : vector<64x64xf32>
    %56 = tpu.matmul %55, %45, %cst_18 {dimension_numbers = #tpu.dot_dimension_numbers<[1], [1], [0], [0], [0, 0, 1, 0], [], []>} : vector<64x64xf32>, vector<64x64xf32>, vector<64x64xf32> -> vector<64x64xf32>
    %c0_19 = arith.constant 0 : index
    %c0_20 = arith.constant 0 : index
    %57 = vector.load %arg2[%c0_19, %c0_20] : memref<67x32xf32, #tpu.memory_space<vmem>>, vector<32x32xf32>
    %c32 = arith.constant 32 : index
    %c0_21 = arith.constant 0 : index
    %58 = vector.load %arg2[%c32, %c0_21] : memref<67x32xf32, #tpu.memory_space<vmem>>, vector<32x32xf32>
    %c64 = arith.constant 64 : index
    %c0_22 = arith.constant 0 : index
    %59 = vector.load %arg2[%c64, %c0_22] : memref<67x32xf32, #tpu.memory_space<vmem>>, vector<1x32xf32>
    %c65 = arith.constant 65 : index
    %c0_23 = arith.constant 0 : index
    %60 = vector.load %arg2[%c65, %c0_23] : memref<67x32xf32, #tpu.memory_space<vmem>>, vector<1x32xf32>
    %c66 = arith.constant 66 : index
    %c0_24 = arith.constant 0 : index
    %61 = vector.load %arg2[%c66, %c0_24] : memref<67x32xf32, #tpu.memory_space<vmem>>, vector<1x32xf32>
    %cst_25 = arith.constant dense<0.000000e+00> : vector<64x32xf32>
    %62 = tpu.matmul %1, %57, %cst_25 {dimension_numbers = #tpu.dot_dimension_numbers<[1], [0], [0], [1], [0, 0, 1, 1], [], []>} : vector<64x32xf32>, vector<32x32xf32>, vector<64x32xf32> -> vector<64x32xf32>
    %cst_26 = arith.constant dense<0.000000e+00> : vector<64x32xf32>
    %63 = tpu.matmul %56, %62, %cst_26 {dimension_numbers = #tpu.dot_dimension_numbers<[1], [0], [0], [1], [0, 0, 1, 1], [], []>} : vector<64x64xf32>, vector<64x32xf32>, vector<64x32xf32> -> vector<64x32xf32>
    %64 = vector.broadcast %59 : vector<1x32xf32> to vector<64x32xf32>
    %65 = arith.addf %63, %64 : vector<64x32xf32>
    %cst_27 = arith.constant 0.000000e+00 : f32
    %66 = vector.broadcast %cst_27 : f32 to vector<64x32xf32>
    %67 = arith.cmpf oge, %65, %66 : vector<64x32xf32>
    %68 = vector.broadcast %61 : vector<1x32xf32> to vector<64x32xf32>
    %69 = arith.mulf %68, %65 : vector<64x32xf32>
    %70 = arith.select %67, %65, %69 : vector<64x32xi1>, vector<64x32xf32>
    %cst_28 = arith.constant dense<0.000000e+00> : vector<64x32xf32>
    %71 = tpu.matmul %70, %58, %cst_28 {dimension_numbers = #tpu.dot_dimension_numbers<[1], [0], [0], [1], [0, 0, 1, 1], [], []>} : vector<64x32xf32>, vector<32x32xf32>, vector<64x32xf32> -> vector<64x32xf32>
    %cst_29 = arith.constant dense<0.000000e+00> : vector<64x32xf32>
    %72 = tpu.matmul %56, %71, %cst_29 {dimension_numbers = #tpu.dot_dimension_numbers<[1], [0], [0], [1], [0, 0, 1, 1], [], []>} : vector<64x64xf32>, vector<64x32xf32>, vector<64x32xf32> -> vector<64x32xf32>
    %73 = vector.broadcast %60 : vector<1x32xf32> to vector<64x32xf32>
    %74 = arith.addf %72, %73 : vector<64x32xf32>
    %75 = arith.addf %74, %1 : vector<64x32xf32>
    %cst_30 = arith.constant 0.000000e+00 : f32
    %76 = vector.broadcast %cst_30 : f32 to vector<64x32xf32>
    %77 = arith.cmpf oge, %75, %76 : vector<64x32xf32>
    %78 = vector.broadcast %61 : vector<1x32xf32> to vector<64x32xf32>
    %79 = arith.mulf %78, %75 : vector<64x32xf32>
    %80 = arith.select %77, %75, %79 : vector<64x32xi1>, vector<64x32xf32>
    %c0_31 = arith.constant 0 : index
    %c0_32 = arith.constant 0 : index
    %c0_33 = arith.constant 0 : index
    %81 = vector.load %arg3[%c0_31, %c0_32, %c0_33] : memref<1x64x32xf32, #tpu.memory_space<vmem>>, vector<1x64x32xf32>
    %82 = vector.shape_cast %81 : vector<1x64x32xf32> to vector<64x32xf32>
    %83 = vector.shape_cast %80 : vector<64x32xf32> to vector<1x64x32xf32>
    tpu.vector_store %arg3[%c0_31, %c0_32, %c0_33], %83 {strides = array<i32>} : memref<1x64x32xf32, #tpu.memory_space<vmem>>, vector<1x64x32xf32>,
    return
  }
  func.func @transform_0(%arg0: i32) -> (i32, i32, i32) {
    %c0_i32 = arith.constant 0 : i32
    %c0_i32_0 = arith.constant 0 : i32
    %c0_i32_1 = arith.constant 0 : i32
    return %arg0, %c0_i32, %c0_i32_0 : i32, i32, i32
  }
  func.func @transform_1(%arg0: i32) -> (i32, i32) {
    %c0_i32 = arith.constant 0 : i32
    %c0_i32_0 = arith.constant 0 : i32
    %c0_i32_1 = arith.constant 0 : i32
    return %c0_i32, %c0_i32_0 : i32, i32
  }
  func.func @transform_2(%arg0: i32) -> (i32, i32, i32) {
    %c0_i32 = arith.constant 0 : i32
    %c0_i32_0 = arith.constant 0 : i32
    %c0_i32_1 = arith.constant 0 : i32
    return %arg0, %c0_i32, %c0_i32_0 : i32, i32, i32
  }
}

</mosaic_0001>

<bundles_post_ra>
// kernel: tpu_custom_call.1
= control target key start
LH: loop header
LB: loop body
LE: loop exit
PB: predicated region body
PF: predicated region fallthrough
CT: control target
= control target key end

     0   :  { %s1147_s9 = smov 0   ;;  %s1604_s0 = inlined_call_operand.vmem [shape: f32[4,64,32], index: 0, kind: input, shape index: {}]   ;;  %s1605_s1 = inlined_call_operand.vmem [shape: f32[67,32], index: 1, kind: input, shape index: {}]   ;;  %s1606_s2 = inlined_call_operand.vmem [shape: f32[4,64,32], index: 2, kind: output, shape index: {}]  }
   0x1 LB: > { %s1006_s10 = sadd.s32 4294967295, %s1128_s9   ;;  %p1010_p0 = scmp.ge.s32.totalorder %s1128_s9, 1  ;;  %s1128_s9 = sphi %s1147_s9, %s12_s9  }
   0x2   : > { %p112_p1 = scmp.lt.s32.totalorder %s1128_s9, 5 }
   0x4   : > { %p113_p2 = pnand %p1010_p0, %p112_p1 }
   0x5   : > { %p134_p3 = scmp.lt.s32.totalorder (!%p113_p2), %s1006_s10, 3 }
   0x6   : > { %116 = sbr.rel (%p113_p2) target bundleno = 1382 (0x566), region = 28 }
   0xb   : > { %s1629_s10 = smov (!%p134_p3, %s1006_s10), 3  ;;  %vm1608_vm0 = vcmask 261120   ;;  %v1130_v18 = vmov 1.0   ;;  %v305_v25 = vlaneseq  ;;  %vm341_vm2 = vcmask 523264  }
   0xc   : > { %s1090_s11 = sshll.u32 %s1629_s10, 6 }
   0xd   : > { %s1163_s14 = scalar_lea.vmem %s1604_s0, %s1090_s11  ;;  %v1262_v26 = vshrl.u32 %v305_v25, 7  ;;  %v1264_v28 = vand.u32 127, %v305_v25  ;;  %s1568_s15 = scalar_lea.vmem %s1606_s2, %s1090_s11 }
   0xe   : > { %v1166_v0 = vld [vmem:[%s1163_s14 + $0x38] sm:$0xff]  ;;  %v1169_v1 = vld [vmem:[%s1163_s14 + $0x30] sm:$0xff]  ;;  %v1181_v4 = vld [vmem:[%s1163_s14 + $0x28] sm:$0xff] }
   0xf   : > { %1015 = vmatpush.xpose.msk.msra.mxu0 %vm1608_vm0, %v1166_v0  ;;  %1092 = vmatpush.xpose.msk.msra.mxu2 %vm1608_vm0, %v1166_v0  ;;  %v257_v2 = vmul.f32 %v1166_v0, %v1166_v0  ;;  %v256_v3 = vmul.f32 %v1169_v1, %v1169_v1  ;;  %v255_v5 = vmul.f32 %v1181_v4, %v1181_v4  ;;  %v1191_v6 = vld [vmem:[%s1163_s14 + $0x20] sm:$0xff]  ;;  %v1201_v8 = vld [vmem:[%s1163_s14 + $0x18] sm:$0xff]  ;;  %v1211_v10 = vld [vmem:[%s1163_s14 + $0x10] sm:$0xff]  ;;  %v157_v20 = vmul.f32 -2.0, %v1181_v4 }
  0x10   : > { %v254_v7 = vmul.f32 %v1191_v6, %v1191_v6  ;;  %v253_v9 = vmul.f32 %v1201_v8, %v1201_v8  ;;  %v252_v11 = vmul.f32 %v1211_v10, %v1211_v10  ;;  %v1221_v12 = vld [vmem:[%s1163_s14 + $0x8] sm:$0xff]  ;;  %v1231_v14 = vld [vmem:[%s1163_s14] sm:$0xff]  ;;  %v156_v17 = vmul.f32 -2.0, %v1191_v6 }
  0x11   : > { %1031 = vmatpush.xpose.msk.msra.mxu1 %vm1608_vm0, %v257_v2  ;;  %v251_v13 = vmul.f32 %v1221_v12, %v1221_v12  ;;  %v250_v15 = vmul.f32 %v1231_v14, %v1231_v14  ;;  %v152_v16 = vmul.f32 -2.0, %v1231_v14  ;;  %v153_v19 = vmul.f32 -2.0, %v1221_v12 }
  0x12   : > { %v154_v21 = vmul.f32 -2.0, %v1211_v10  ;;  %v158_v22 = vmul.f32 -2.0, %v1169_v1  ;;  %v155_v23 = vmul.f32 -2.0, %v1201_v8  ;;  %v159_v24 = vmul.f32 -2.0, %v1166_v0 }
  0x13   : > { %1016 = vmatpush.xpose.msk.msra.mxu0 %vm1608_vm0, %v1169_v1  ;;  %1093 = vmatpush.xpose.msk.msra.mxu2 %vm1608_vm0, %v1169_v1  ;;  %v1267_v30 = vadd.s32 32, %v1262_v26  ;;  %vm316_vm1 = vcmp.ne.s32.totalorder %v1264_v28, %v1262_v26  ;;  %v1272_v34 = vadd.s32 8, %v1262_v26  ;;  %v1287_v42 = vadd.s32 40, %v1262_v26 }
  0x14   : > { %v1290_v43 = vadd.s32 16, %v1262_v26  ;;  %v1305_v52 = vadd.s32 48, %v1262_v26  ;;  %v1312_v55 = vadd.s32 24, %v1262_v26  ;;  %v1323_v62 = vadd.s32 56, %v1262_v26 }
  0x15   : > { %1032 = vmatpush.xpose.msk.msra.mxu1 %vm1608_vm0, %v256_v3  ;;  %vm320_vm3 = vcmp.ne.s32.totalorder %v1264_v28, %v1267_v30  ;;  %vm317_vm4 = vcmp.ne.s32.totalorder %v1264_v28, %v1272_v34  ;;  %vm321_vm5 = vcmp.ne.s32.totalorder %v1264_v28, %v1287_v42 }
  0x16   : > { %vm318_vm6 = vcmp.ne.s32.totalorder %v1264_v28, %v1290_v43  ;;  %vm1607_vm7 = vcmp.ne.s32.totalorder %v1264_v28, %v1305_v52  ;;  %vm319_vm8 = vcmp.ne.s32.totalorder %v1264_v28, %v1312_v55  ;;  %vm1609_vm9 = vcmp.ne.s32.totalorder %v1264_v28, %v1323_v62 }
  0x17   : > { %1017 = vmatpush.xpose.msk.msra.mxu0 %vm1608_vm0, %v1181_v4  ;;  %1094 = vmatpush.xpose.msk.msra.mxu2 %vm1608_vm0, %v1181_v4 }
  0x19   : > { %1033 = vmatpush.xpose.msk.msra.mxu1 %vm1608_vm0, %v255_v5 }
  0x1b   : > { %1018 = vmatpush.xpose.msk.msra.mxu0 %vm1608_vm0, %v1191_v6  ;;  %1095 = vmatpush.xpose.msk.msra.mxu2 %vm1608_vm0, %v1191_v6 }
  0x1d   : > { %1034 = vmatpush.xpose.msk.msra.mxu1 %vm1608_vm0, %v254_v7 }
  0x1f   : > { %1019 = vmatpush.xpose.msk.msra.mxu0 %vm1608_vm0, %v1201_v8  ;;  %1096 = vmatpush.xpose.msk.msra.mxu2 %vm1608_vm0, %v1201_v8 }
  0x21   : > { %1035 = vmatpush.xpose.msk.msra.mxu1 %vm1608_vm0, %v253_v9 }
  0x23   : > { %1020 = vmatpush.xpose.msk.msra.mxu0 %vm1608_vm0, %v1211_v10  ;;  %1097 = vmatpush.xpose.msk.msra.mxu2 %vm1608_vm0, %v1211_v10 }
  0x25   : > { %1036 = vmatpush.xpose.msk.msra.mxu1 %vm1608_vm0, %v252_v11 }
  0x27   : > { %1021 = vmatpush.xpose.msk.msra.mxu0 %vm1608_vm0, %v1221_v12  ;;  %1098 = vmatpush.xpose.msk.msra.mxu2 %vm1608_vm0, %v1221_v12 }
  0x29   : > { %1037 = vmatpush.xpose.msk.msra.mxu1 %vm1608_vm0, %v251_v13 }
  0x2b   : > { %1022 = vmatpush.xpose.msk.msra.mxu0 %vm1608_vm0, %v1231_v14  ;;  %1099 = vmatpush.xpose.msk.msra.mxu2 %vm1608_vm0, %v1231_v14 }
  0x2d   : > { %1038 = vmatpush.xpose.msk.msra.mxu1 %vm1608_vm0, %v250_v15 }
  0x2e   : > { %1023 = vmatmul.msk.f32.vlgmr.msra.gmra.mxu0 %vm1608_vm0, %v152_v16  ;;  %1027 = vmatmul.msk.f32.vlgmr.msra.gmra.mxu2 %vm1608_vm0, %v156_v17 }
  0x30   : > { %1039 = vmatmul.msk.f32.vlgmr.msra.gmra.mxu1 %vm1608_vm0, %v1130_v18 }
  0x36   : > { %1024 = vmatmul.msk.f32.gmra.mxu0 %vm1608_vm0, %v153_v19  ;;  %1028 = vmatmul.msk.f32.gmra.mxu2 %vm1608_vm0, %v157_v20 }
  0x3e   : > { %1025 = vmatmul.msk.f32.gmra.mxu0 %vm1608_vm0, %v154_v21  ;;  %1029 = vmatmul.msk.f32.gmra.mxu2 %vm1608_vm0, %v158_v22 }
  0x46   : > { %1026 = vmatmul.msk.f32.gmra.mxu0 %vm1608_vm0, %v155_v23  ;;  %1030 = vmatmul.msk.f32.gmra.mxu2 %vm1608_vm0, %v159_v24 }
  0xab   : > { %v226_v27 = vpop.f32.mrf.mxu0 }
  0xad   : > { %v302_v29 = vpop.f32.mrf.mxu1 }
  0xae   : > { %v324_v31 = vperm.slane %v302_v29, 0 }
  0xb0   : > { %v325_v32 = vadd.f32 %v324_v31, %v226_v27 }
  0xb1   : > { %v238_v33 = vpop.f32.mrf.mxu2 }
  0xb2   : > { %v329_v35 = vadd.f32 %v324_v31, %v238_v33  ;;  %v333_v36 = vsel %vm316_vm1, %v325_v32, inf }
  0xb3   : > { %v229_v37 = vpop.f32.mrf.mxu0  ;;  %v342_v38 = vsel %vm341_vm2, %v333_v36, inf }
  0xb4   : > { %v326_v39 = vadd.f32 %v324_v31, %v229_v37  ;;  %343 = vmin.xlane.f32.xlu0 %v342_v38  ;;  %v337_v40 = vsel %vm320_vm3, %v329_v35, inf }
  0xb5   : > { %v354_v41 = vsel %vm341_vm2, %v337_v40, inf }
  0xb6   : > { %355 = vmin.xlane.f32.xlu2 %v354_v41  ;;  %v334_v44 = vsel %vm317_vm4, %v326_v39, inf }
  0xb7   : > { %v345_v48 = vsel %vm341_vm2, %v334_v44, inf }
  0xb9   : > { %v241_v45 = vpop.f32.mrf.mxu2 }
  0xba   : > { %v330_v46 = vadd.f32 %v324_v31, %v241_v45 }
  0xbb   : > { %v232_v47 = vpop.f32.mrf.mxu0 }
  0xbc   : > { %v338_v49 = vsel %vm321_vm5, %v330_v46, inf  ;;  %v327_v50 = vadd.f32 %v324_v31, %v232_v47  ;;  %346 = vmin.xlane.f32.xlu0 %v345_v48 }
  0xbd   : > { %v357_v51 = vsel %vm341_vm2, %v338_v49, inf }
  0xbe   : > { %358 = vmin.xlane.f32.xlu2 %v357_v51  ;;  %v335_v53 = vsel %vm318_vm6, %v327_v50, inf }
  0xbf   : > { %v348_v54 = vsel %vm341_vm2, %v335_v53, inf }
  0xc0   : > { %349 = vmin.xlane.f32.xlu1 %v348_v54 }
  0xc1   : > { %v244_v56 = vpop.f32.mrf.mxu2 }
  0xc2   : > { %v331_v57 = vadd.f32 %v324_v31, %v244_v56 }
  0xc3   : > { %v235_v58 = vpop.f32.mrf.mxu0 }
  0xc4   : > { %v339_v59 = vsel %vm1607_vm7, %v331_v57, inf  ;;  %v328_v60 = vadd.f32 %v324_v31, %v235_v58 }
  0xc5   : > { %v360_v61 = vsel %vm341_vm2, %v339_v59, inf }
  0xc6   : > { %v336_v63 = vsel %vm319_vm8, %v328_v60, inf  ;;  %361 = vmin.xlane.f32.xlu0 %v360_v61 }
  0xc7   : > { %v351_v2 = vsel %vm341_vm2, %v336_v63, inf }
  0xc8   : > { %352 = vmin.xlane.f32.xlu1 %v351_v2 }
  0xc9   : > { %v247_v3 = vpop.f32.mrf.mxu2 }
  0xca   : > { %v332_v5 = vadd.f32 %v324_v31, %v247_v3 }
  0xcc   : > { %v340_v7 = vsel %vm1609_vm9, %v332_v5, inf }
  0xcd   : > { %v363_v9 = vsel %vm341_vm2, %v340_v7, inf }
  0xd0   : > { %364 = vmin.xlane.f32.xlu1 %v363_v9 }
 0x127   : > { %v344_v11 = vpop.xlane.xlu0 %343 }
 0x128   : > { %vm366_vm10 = vcmp.eq.f32.partialorder %v333_v36, %v344_v11 }
 0x129   : > { %v374_v13 = vsel %vm366_vm10, inf, %v333_v36  ;;  %v356_v16 = vpop.xlane.xlu2 %355 }
 0x12a   : > { %v382_v15 = vsel %vm341_vm2, %v374_v13, inf  ;;  %vm370_vm12 = vcmp.eq.f32.partialorder %v337_v40, %v356_v16  ;;  %v663_v16 = vld [vmem:[%s1605_s1 + $0x10] sm:$0xff] }
 0x12b   : > { %383 = vmin.xlane.f32.xlu2 %v382_v15  ;;  %v378_v24 = vsel %vm370_vm12, inf, %v337_v40  ;;  %v664_v15 = vld [vmem:[%s1605_s1 + $0x18] sm:$0xff] }
 0x12c   : > { %v394_v25 = vsel %vm341_vm2, %v378_v24, inf  ;;  %684 = vmatpush.msra.mxu3 %v664_v15 }
 0x12e   : > { %685 = vmatpush.msra.mxu3 %v663_v16 }
 0x12f   : > { %v347_v17 = vpop.xlane.xlu0 %346 }
 0x130   : > { %vm367_vm11 = vcmp.eq.f32.partialorder %v334_v44, %v347_v17 }
 0x131   : > { %v375_v18 = vsel %vm367_vm11, inf, %v334_v44  ;;  %v359_v21 = vpop.xlane.xlu2 %358 }
 0x132   : > { %v385_v19 = vsel %vm341_vm2, %v375_v18, inf  ;;  %vm371_vm14 = vcmp.eq.f32.partialorder %v338_v49, %v359_v21 }
 0x133   : > { %386 = vmin.xlane.f32.xlu0 %v385_v19  ;;  %v350_v20 = vpop.xlane.xlu1 %349  ;;  %v379_v27 = vsel %vm371_vm14, inf, %v338_v49 }
 0x134   : > { %vm368_vm13 = vcmp.eq.f32.partialorder %v335_v53, %v350_v20  ;;  %v397_v33 = vsel %vm341_vm2, %v379_v27, inf  ;;  %v661_v20 = vld [vmem:[%s1605_s1] sm:$0xff] }
 0x135   : > { %v376_v22 = vsel %vm368_vm13, inf, %v335_v53 }
 0x136   : > { %v388_v23 = vsel %vm341_vm2, %v376_v22, inf }
 0x137   : > { %389 = vmin.xlane.f32.xlu1 %v388_v23 }
 0x139   : > { %v362_v31 = vpop.xlane.xlu0 %361 }
 0x13a   : > { %vm372_vm10 = vcmp.eq.f32.partialorder %v339_v59, %v362_v31 }
 0x13b   : > { %395 = vmin.xlane.f32.xlu0 %v394_v25  ;;  %v353_v29 = vpop.xlane.xlu1 %352  ;;  %v380_v36 = vsel %vm372_vm10, inf, %v339_v59 }
 0x13c   : > { %vm369_vm15 = vcmp.eq.f32.partialorder %v336_v63, %v353_v29  ;;  %v400_v39 = vsel %vm341_vm2, %v380_v36, inf }
 0x13d   : > { %v377_v32 = vsel %vm369_vm15, inf, %v336_v63 }
 0x13e   : > { %v391_v35 = vsel %vm341_vm2, %v377_v32, inf }
 0x13f   : > { %398 = vmin.xlane.f32.xlu1 %v397_v33  ;;  %392 = vmin.xlane.f32.xlu2 %v391_v35 }
 0x143   : > { %v365_v37 = vpop.xlane.xlu1 %364 }
 0x144   : > { %vm373_vm11 = vcmp.eq.f32.partialorder %v340_v7, %v365_v37 }
 0x145   : > { %v381_v38 = vsel %vm373_vm11, inf, %v340_v7 }
 0x146   : > { %v403_v40 = vsel %vm341_vm2, %v381_v38, inf }
 0x147   : > { %401 = vmin.xlane.f32.xlu2 %v400_v39  ;;  %404 = vmin.xlane.f32.xlu0 %v403_v40 }
 0x19e   : > { %v384_v41 = vpop.xlane.xlu2 %383 }
 0x19f   : > { %vm406_vm12 = vcmp.eq.f32.partialorder %v374_v13, %v384_v41 }
 0x1a0   : > { %v414_v44 = vsel %vm406_vm12, inf, %v374_v13 }
 0x1a1   : > { %v422_v45 = vsel %vm341_vm2, %v414_v44, inf }
 0x1a2   : > { %423 = vmin.xlane.f32.xlu1 %v422_v45 }
 0x1a6   : > { %v387_v46 = vpop.xlane.xlu0 %386 }
 0x1a7   : > { %vm407_vm13 = vcmp.eq.f32.partialorder %v375_v18, %v387_v46 }
 0x1a8   : > { %v415_v47 = vsel %vm407_vm13, inf, %v375_v18  ;;  %v662_v18 = vld [vmem:[%s1605_s1 + $0x8] sm:$0xff] }
 0x1a9   : > { %v425_v48 = vsel %vm341_vm2, %v415_v47, inf  ;;  %686 = vmatpush.msra.mxu3 %v662_v18 }
 0x1aa   : > { %426 = vmin.xlane.f32.xlu2 %v425_v48  ;;  %v390_v49 = vpop.xlane.xlu1 %389 }
 0x1ab   : > { %vm408_vm14 = vcmp.eq.f32.partialorder %v376_v22, %v390_v49  ;;  %687 = vmatpush.msra.mxu3 %v661_v20 }
 0x1ac   : > { %v416_v50 = vsel %vm408_vm14, inf, %v376_v22  ;;  %1056 = vmatmul.msk.f32.vlgmr.msra.gmra.mxu3 %vm1608_vm0, %v1231_v14 }
 0x1ad   : > { %v428_v51 = vsel %vm341_vm2, %v416_v50, inf }
 0x1ae   : > { %v396_v53 = vpop.xlane.xlu0 %395  ;;  %429 = vmin.xlane.f32.xlu0 %v428_v51 }
 0x1af   : > { %vm410_vm15 = vcmp.eq.f32.partialorder %v378_v24, %v396_v53 }
 0x1b0   : > { %v418_v54 = vsel %vm410_vm15, inf, %v378_v24 }
 0x1b1   : > { %v434_v56 = vsel %vm341_vm2, %v418_v54, inf }
 0x1b2   : > { %435 = vmin.xlane.f32.xlu2 %v434_v56  ;;  %v393_v57 = vpop.xlane.xlu2 %392  ;;  %v399_v58 = vpop.xlane.xlu1 %398 }
 0x1b3   : > { %vm409_vm10 = vcmp.eq.f32.partialorder %v377_v32, %v393_v57  ;;  %vm411_vm11 = vcmp.eq.f32.partialorder %v379_v27, %v399_v58 }
 0x1b4   : > { %v417_v59 = vsel %vm409_vm10, inf, %v377_v32  ;;  %v419_v60 = vsel %vm411_vm11, inf, %v379_v27  ;;  %1057 = vmatmul.msk.f32.gmra.mxu3 %vm1608_vm0, %v1221_v12 }
 0x1b5   : > { %v431_v61 = vsel %vm341_vm2, %v417_v59, inf  ;;  %v437_v63 = vsel %vm341_vm2, %v419_v60, inf }
 0x1b6   : > { %432 = vmin.xlane.f32.xlu1 %v431_v61  ;;  %438 = vmin.xlane.f32.xlu0 %v437_v63 }
 0x1ba   : > { %v402_v2 = vpop.xlane.xlu2 %401  ;;  %v405_v3 = vpop.xlane.xlu0 %404 }
 0x1bb   : > { %vm412_vm12 = vcmp.eq.f32.partialorder %v380_v36, %v402_v2  ;;  %vm413_vm13 = vcmp.eq.f32.partialorder %v381_v38, %v405_v3 }
 0x1bc   : > { %v420_v5 = vsel %vm412_vm12, inf, %v380_v36  ;;  %v421_v7 = vsel %vm413_vm13, inf, %v381_v38  ;;  %1058 = vmatmul.msk.f32.gmra.mxu3 %vm1608_vm0, %v1211_v10 }
 0x1bd   : > { %v440_v9 = vsel %vm341_vm2, %v420_v5, inf  ;;  %v443_v11 = vsel %vm341_vm2, %v421_v7, inf }
 0x1be   : > { %441 = vmin.xlane.f32.xlu1 %v440_v9  ;;  %444 = vmin.xlane.f32.xlu2 %v443_v11 }
 0x1c4   : > { %1059 = vmatmul.msk.f32.gmra.mxu3 %vm1608_vm0, %v1201_v8 }
 0x1cc   : > { %1060 = vmatmul.msk.f32.gmra.mxu3 %vm1608_vm0, %v1191_v6 }
 0x1d4   : > { %1061 = vmatmul.msk.f32.gmra.mxu3 %vm1608_vm0, %v1181_v4  ;;  %v1131_v4 = vmov 0.0  }
 0x1dc   : > { %1062 = vmatmul.msk.f32.gmra.mxu3 %vm1608_vm0, %v1169_v1 }
 0x1e4   : > { %1063 = vmatmul.msk.f32.gmra.mxu3 %vm1608_vm0, %v1166_v0 }
 0x215   : > { %v424_v13 = vpop.xlane.xlu1 %423 }
 0x216   : > { %vm446_vm14 = vcmp.eq.f32.partialorder %v414_v44, %v424_v13 }
 0x217   : > { %v454_v17 = vsel %vm446_vm14, inf, %v414_v44 }
 0x218   : > { %v462_v19 = vsel %vm341_vm2, %v454_v17, inf }
 0x219   : > { %463 = vmin.xlane.f32.xlu0 %v462_v19 }
 0x21d   : > { %v427_v21 = vpop.xlane.xlu2 %426 }
 0x21e   : > { %vm447_vm15 = vcmp.eq.f32.partialorder %v415_v47, %v427_v21 }
 0x21f   : > { %v455_v22 = vsel %vm447_vm15, inf, %v415_v47 }
 0x220   : > { %v465_v23 = vsel %vm341_vm2, %v455_v22, inf }
 0x221   : > { %466 = vmin.xlane.f32.xlu1 %v465_v23  ;;  %v430_v24 = vpop.xlane.xlu0 %429 }
 0x222   : > { %vm448_vm10 = vcmp.eq.f32.partialorder %v416_v50, %v430_v24 }
 0x223   : > { %v456_v25 = vsel %vm448_vm10, inf, %v416_v50 }
 0x224   : > { %v468_v27 = vsel %vm341_vm2, %v456_v25, inf }
 0x225   : > { %v436_v29 = vpop.xlane.xlu2 %435  ;;  %469 = vmin.xlane.f32.xlu2 %v468_v27 }
 0x226   : > { %vm450_vm11 = vcmp.eq.f32.partialorder %v418_v54, %v436_v29 }
 0x227   : > { %v458_v31 = vsel %vm450_vm11, inf, %v418_v54 }
 0x228   : > { %v474_v32 = vsel %vm341_vm2, %v458_v31, inf }
 0x229   : > { %475 = vmin.xlane.f32.xlu1 %v474_v32  ;;  %v439_v33 = vpop.xlane.xlu0 %438  ;;  %v433_v35 = vpop.xlane.xlu1 %432 }
 0x22a   : > { %vm451_vm12 = vcmp.eq.f32.partialorder %v419_v60, %v439_v33  ;;  %vm449_vm13 = vcmp.eq.f32.partialorder %v417_v59, %v433_v35 }
 0x22b   : > { %v459_v36 = vsel %vm451_vm12, inf, %v419_v60  ;;  %v457_v37 = vsel %vm449_vm13, inf, %v417_v59 }
 0x22c   : > { %v477_v38 = vsel %vm341_vm2, %v459_v36, inf  ;;  %v471_v39 = vsel %vm341_vm2, %v457_v37, inf }
 0x22d   : > { %478 = vmin.xlane.f32.xlu2 %v477_v38  ;;  %472 = vmin.xlane.f32.xlu0 %v471_v39 }
 0x22f   : > { %v689_v20 = vpop.f32.mrf.mxu3 }
 0x231   : > { %v445_v40 = vpop.xlane.xlu2 %444  ;;  %v442_v41 = vpop.xlane.xlu1 %441 }
 0x232   : > { %vm453_vm14 = vcmp.eq.f32.partialorder %v421_v7, %v445_v40  ;;  %vm452_vm15 = vcmp.eq.f32.partialorder %v420_v5, %v442_v41 }
 0x233   : > { %v461_v44 = vsel %vm453_vm14, inf, %v421_v7  ;;  %v460_v45 = vsel %vm452_vm15, inf, %v420_v5 }
 0x234   : > { %v483_v46 = vsel %vm341_vm2, %v461_v44, inf  ;;  %v480_v47 = vsel %vm341_vm2, %v460_v45, inf }
 0x235   : > { %484 = vmin.xlane.f32.xlu1 %v483_v46  ;;  %481 = vmin.xlane.f32.xlu0 %v480_v47 }
 0x28c   : > { %v464_v48 = vpop.xlane.xlu0 %463 }
 0x28d   : > { %vm486_vm10 = vcmp.eq.f32.partialorder %v454_v17, %v464_v48 }
 0x28e   : > { %v494_v50 = vsel %vm486_vm10, inf, %v454_v17 }
 0x28f   : > { %vm502_vm13 = vcmp.eq.f32.partialorder %v494_v50, inf }
 0x290   : > { %vm510_vm0 = vmand %vm502_vm13, %vm316_vm1 }
 0x291   : > { %v1400_v34 = vsel %vm510_vm0, 1.0, %v1131_v4 }
 0x292   : > { %v526_v63 = vsel %vm341_vm2, %v1400_v34, 0.0 }
 0x294   : > { %v467_v49 = vpop.xlane.xlu1 %466 }
 0x295   : > { %vm487_vm11 = vcmp.eq.f32.partialorder %v455_v22, %v467_v49 }
 0x296   : > { %v495_v51 = vsel %vm487_vm11, inf, %v455_v22 }
 0x297   : > { %vm503_vm12 = vcmp.eq.f32.partialorder %v495_v51, inf }
 0x298   : > { %v470_v53 = vpop.xlane.xlu2 %469  ;;  %vm511_vm7 = vmand %vm503_vm12, %vm317_vm4 }
 0x299   : > { %vm488_vm14 = vcmp.eq.f32.partialorder %v456_v25, %v470_v53  ;;  %v1396_v56 = vsel %vm511_vm7, 1.0, %v1131_v4 }
 0x29a   : > { %v496_v54 = vsel %vm488_vm14, inf, %v456_v25  ;;  %v527_v26 = vsel %vm341_vm2, %v1396_v56, 0.0  ;;  %v692_v25 = vpop.f32.mrf.mxu3 }
 0x29b   : > { %vm504_vm15 = vcmp.eq.f32.partialorder %v496_v54, inf  ;;  %v528_v2 = vadd.f32 %v527_v26, %v526_v63 }
 0x29c   : > { %v476_v1 = vpop.xlane.xlu1 %475  ;;  %vm512_vm10 = vmand %vm504_vm15, %vm318_vm6 }
 0x29d   : > { %vm490_vm9 = vcmp.eq.f32.partialorder %v458_v31, %v476_v1  ;;  %v1398_v59 = vsel %vm512_vm10, 1.0, %v1131_v4  ;;  %vm1611_vm10 = vcmp.ne.s32.totalorder %v1264_v28, %v1305_v52 }
 0x29e   : > { %v498_v0 = vsel %vm490_vm9, inf, %v458_v31  ;;  %v529_v43 = vsel %vm341_vm2, %v1398_v59, 0.0 }
 0x29f   : > { %vm506_vm11 = vcmp.eq.f32.partialorder %v498_v0, inf  ;;  %v530_v7 = vadd.f32 %v529_v43, %v528_v2  ;;  %v668_v2 = vld [vmem:[%s1605_s1 + $0x38] sm:$0xff] }
 0x2a0   : > { %v479_v57 = vpop.xlane.xlu2 %478  ;;  %v473_v58 = vpop.xlane.xlu0 %472  ;;  %vm514_vm6 = vmand %vm506_vm11, %vm320_vm3  ;;  %1100 = vmatpush.msrb.mxu3 %v668_v2 }
 0x2a1   : > { %vm491_vm4 = vcmp.eq.f32.partialorder %v459_v36, %v479_v57  ;;  %vm489_vm12 = vcmp.eq.f32.partialorder %v457_v37, %v473_v58  ;;  %v1414_v3 = vsel %vm514_vm6, 1.0, %v1131_v4 }
 0x2a2   : > { %v499_v60 = vsel %vm491_vm4, inf, %v459_v36  ;;  %v497_v61 = vsel %vm489_vm12, inf, %v457_v37  ;;  %v533_v55 = vsel %vm341_vm2, %v1414_v3, 0.0  ;;  %v695_v33 = vpop.f32.mrf.mxu3 }
 0x2a3   : > { %vm505_vm1 = vcmp.eq.f32.partialorder %v497_v61, inf  ;;  %vm507_vm0 = vcmp.eq.f32.partialorder %v499_v60, inf }
 0x2a4   : > { %vm513_vm7 = vmand %vm505_vm1, %vm319_vm8 }
 0x2a5   : > { %v1416_v5 = vsel %vm513_vm7, 1.0, %v1131_v4  ;;  %vm515_vm3 = vmand %vm507_vm0, %vm321_vm5  ;;  %vm1610_vm5 = vcmp.ne.s32.totalorder %v1264_v28, %v1323_v62 }
 0x2a6   : > { %v531_v30 = vsel %vm341_vm2, %v1416_v5, 0.0  ;;  %v1425_v17 = vsel %vm515_vm3, 1.0, %v1131_v4  ;;  %vm1612_vm3 = vcmask 261120  }
 0x2a7   : > { %v532_v13 = vadd.f32 %v531_v30, %v530_v7  ;;  %v535_v19 = vsel %vm341_vm2, %v1425_v17, 0.0 }
 0x2a8   : > { %v482_v9 = vpop.xlane.xlu0 %481  ;;  %v485_v11 = vpop.xlane.xlu1 %484 }
 0x2a9   : > { %vm492_vm9 = vcmp.eq.f32.partialorder %v460_v45, %v482_v9  ;;  %vm493_vm13 = vcmp.eq.f32.partialorder %v461_v44, %v485_v11  ;;  %v534_v18 = vadd.f32 %v533_v55, %v532_v13  ;;  %v665_v13 = vld [vmem:[%s1605_s1 + $0x20] sm:$0xff] }
 0x2aa   : > { %v500_v15 = vsel %vm492_vm9, inf, %v460_v45  ;;  %v501_v16 = vsel %vm493_vm13, inf, %v461_v44  ;;  %v698_v36 = vpop.f32.mrf.mxu3  ;;  %v1114_v55 = vld [vmem:[%s1605_s1 + $0x40] ss:$0 sm:$0xff]  ;;  %vm1613_vm13 = vmmov %vm1612_vm3 }
 0x2ab   : > { %vm508_vm8 = vcmp.eq.f32.partialorder %v500_v15, inf  ;;  %vm509_vm14 = vcmp.eq.f32.partialorder %v501_v16, inf  ;;  %v536_v22 = vadd.f32 %v535_v19, %v534_v18  ;;  %v1525_v15 = vld [vmem:[%s1605_s1 + $0x42] ss:$0 sm:$0xff] }
 0x2ac   : > { %vm517_vm15 = vmand %vm509_vm14, %vm1610_vm5 }
 0x2ad   : > { %v1430_v42 = vsel %vm517_vm15, 1.0, %v1131_v4  ;;  %vm516_vm11 = vmand %vm508_vm8, %vm1611_vm10 }
 0x2ae   : > { %1040 = vmatpush.xpose.msk.msrb.mxu2 %vm341_vm2, %v1430_v42  ;;  %v1439_v21 = vsel %vm516_vm11, 1.0, %v1131_v4  ;;  %v539_v24 = vsel %vm341_vm2, %v1430_v42, 0.0  ;;  %vm1614_vm14 = vmmov %vm1612_vm3 }
 0x2af   : > { %v537_v62 = vsel %vm341_vm2, %v1439_v21, 0.0  ;;  %vm1615_vm15 = vmmov %vm1612_vm3 }
 0x2b0   : > { %v538_v23 = vadd.f32 %v537_v62, %v536_v22  ;;  %vm1616_vm11 = vmmov %vm1612_vm3 }
 0x2b2   : > { %1041 = vmatpush.xpose.msk.msrb.mxu2 %vm341_vm2, %v1439_v21  ;;  %v540_v28 = vadd.f32 %v539_v24, %v538_v23  ;;  %v701_v46 = vpop.f32.mrf.mxu3 }
 0x2b4   : > { %v541_v52 = vrot.slane %v540_v28, 4 }
 0x2b6   : > { %1042 = vmatpush.xpose.msk.msrb.mxu2 %vm341_vm2, %v1425_v17  ;;  %v542_v27 = vadd.f32 %v541_v52, %v540_v28 }
 0x2b8   : > { %v543_v29 = vrot.slane %v542_v27, 2 }
 0x2ba   : > { %1043 = vmatpush.xpose.msk.msrb.mxu2 %vm341_vm2, %v1414_v3  ;;  %v544_v31 = vadd.f32 %v543_v29, %v542_v27  ;;  %v704_v54 = vpop.f32.mrf.mxu3 }
 0x2bc   : > { %v545_v32 = vrot.slane %v544_v31, 1 }
 0x2be   : > { %1044 = vmatpush.xpose.msk.msrb.mxu2 %vm341_vm2, %v1416_v5  ;;  %v546_v35 = vadd.f32 %v545_v32, %v544_v31 }
 0x2c0   : > { %1117 = vrcp.f32 %v546_v35  ;;  %v559_v40 = vand.u32 2147483648, %v546_v35  ;;  %v557_v44 = vand.u32 2147483647, %v546_v35  ;;  %vm553_vm12 = vweird.f32 %v546_v35 }
 0x2c1   : > { %vm547_vm0 = vcmp.gt.f32.partialorder %v546_v35, 0.0 }
 0x2c2   : > { %1045 = vmatpush.xpose.msk.msrb.mxu2 %vm341_vm2, %v1398_v59  ;;  %v560_v47 = vor.u32 1.1754944e-38, %v559_v40  ;;  %vm558_vm6 = vcmp.eq.f32.partialorder %v557_v44, 8.507059e+37  ;;  %v707_v0 = vpop.f32.mrf.mxu3 }
 0x2c6   : > { %v1118_v37 = vpop.eup %1117  ;;  %1046 = vmatpush.xpose.msk.msrb.mxu2 %vm341_vm2, %v1396_v56 }
 0x2c7   : > { %v549_v38 = vmul.f32 %v1118_v37, %v546_v35  ;;  %vm554_vm4 = vweird.f32 %v1118_v37 }
 0x2c8   : > { %vm555_vm1 = vmor %vm553_vm12, %vm554_vm4 }
 0x2c9   : > { %v550_v39 = vsub.f32 1.0, %v549_v38  ;;  %vm1617_vm12 = vmmov %vm1612_vm3 }
 0x2ca   : > { %1047 = vmatpush.xpose.msk.msrb.mxu2 %vm341_vm2, %v1400_v34  ;;  %v710_v57 = vpop.f32.mrf.mxu3 }
 0x2cb   : > { %v551_v41 = vmul.f32 %v1118_v37, %v550_v39  ;;  %746 = vmatpush.msrb.mxu1 %v710_v57 }
 0x2cd   : > { %v552_v45 = vadd.f32 %v1118_v37, %v551_v41  ;;  %747 = vmatpush.msrb.mxu1 %v707_v0 }
 0x2cf   : > { %v556_v48 = vsel %vm555_vm1, %v1118_v37, %v552_v45  ;;  %748 = vmatpush.msrb.mxu1 %v704_v54 }
 0x2d0   : > { %v561_v49 = vsel %vm558_vm6, %v560_v47, %v556_v48  ;;  %vm1618_vm6 = vmmov %vm1612_vm3 }
 0x2d1   : > { %v562_v50 = vmul.f32 0.25, %v561_v49  ;;  %749 = vmatpush.msrb.mxu1 %v701_v46 }
 0x2d3   : > { %v563_v51 = vsel %vm547_vm0, %v562_v50, 0.0  ;;  %750 = vmatpush.msrb.mxu1 %v698_v36 }
 0x2d4   : > { %v564_v53 = vmul.f32 %v563_v51, %v1400_v34  ;;  %v565_v1 = vmul.f32 %v563_v51, %v1396_v56  ;;  %v566_v4 = vmul.f32 %v563_v51, %v1398_v59  ;;  %v567_v58 = vmul.f32 %v563_v51, %v1416_v5  ;;  %v666_v5 = vld [vmem:[%s1605_s1 + $0x28] sm:$0xff] }
 0x2d5   : > { %751 = vmatpush.msrb.mxu1 %v695_v33  ;;  %v568_v56 = vmul.f32 %v563_v51, %v1414_v3  ;;  %v569_v59 = vmul.f32 %v563_v51, %v1425_v17  ;;  %v570_v34 = vmul.f32 %v563_v51, %v1439_v21  ;;  %v571_v26 = vmul.f32 %v563_v51, %v1430_v42  ;;  %v667_v3 = vld [vmem:[%s1605_s1 + $0x30] sm:$0xff] }
 0x2d6   : > { %1048 = vmatmul.msk.f32.vlgmr.msrb.gmra.mxu2 %vm341_vm2, %v564_v53  ;;  %1101 = vmatpush.msrb.mxu3 %v667_v3 }
 0x2d7   : > { %752 = vmatpush.msrb.mxu1 %v692_v25 }
 0x2d8   : > { %1102 = vmatpush.msrb.mxu3 %v666_v5 }
 0x2d9   : > { %753 = vmatpush.msrb.mxu1 %v689_v20 }
 0x2da   : > { %1103 = vmatpush.msrb.mxu3 %v665_v13 }
 0x2db   : > { %840 = vmatpush.msra.mxu1 %v668_v2 }
 0x2dd   : > { %841 = vmatpush.msra.mxu1 %v667_v3 }
 0x2de   : > { %1049 = vmatmul.msk.f32.gmra.mxu2 %vm341_vm2, %v565_v1 }
 0x2df   : > { %842 = vmatpush.msra.mxu1 %v666_v5 }
 0x2e1   : > { %843 = vmatpush.msra.mxu1 %v665_v13 }
 0x2e6   : > { %1050 = vmatmul.msk.f32.gmra.mxu2 %vm341_vm2, %v566_v4 }
 0x2ee   : > { %1051 = vmatmul.msk.f32.gmra.mxu2 %vm341_vm2, %v567_v58  ;;  %v1116_v58 = vld [vmem:[%s1605_s1 + $0x41] ss:$0 sm:$0xff] }
 0x2f6   : > { %1052 = vmatmul.msk.f32.gmra.mxu2 %vm341_vm2, %v568_v56 }
 0x2fe   : > { %1053 = vmatmul.msk.f32.gmra.mxu2 %vm341_vm2, %v569_v59 }
 0x306   : > { %1054 = vmatmul.msk.f32.gmra.mxu2 %vm341_vm2, %v570_v34 }
 0x30e   : > { %1055 = vmatmul.msk.f32.gmra.mxu2 %vm341_vm2, %v571_v26 }
 0x359   : > { %v1475_v60 = vpop.f32.mrf.mxu2 }
 0x35a   : > { %1064 = vmatmul.msk.f32.vlgmr.msrb.gmra.mxu1 %vm341_vm2, %v1475_v60 }
 0x361   : > { %v1479_v61 = vpop.f32.mrf.mxu2 }
 0x362   : > { %1065 = vmatmul.msk.f32.gmra.mxu1 %vm341_vm2, %v1479_v61 }
 0x369   : > { %v1483_v43 = vpop.f32.mrf.mxu2 }
 0x36a   : > { %1066 = vmatmul.msk.f32.gmra.mxu1 %vm341_vm2, %v1483_v43 }
 0x371   : > { %v1487_v63 = vpop.f32.mrf.mxu2 }
 0x372   : > { %1067 = vmatmul.msk.f32.gmra.mxu1 %vm341_vm2, %v1487_v63 }
 0x379   : > { %v1500_v7 = vpop.f32.mrf.mxu2 }
 0x37a   : > { %1068 = vmatmul.msk.f32.gmra.mxu1 %vm341_vm2, %v1500_v7 }
 0x381   : > { %v1504_v30 = vpop.f32.mrf.mxu2 }
 0x382   : > { %1069 = vmatmul.msk.f32.gmra.mxu1 %vm341_vm2, %v1504_v30 }
 0x389   : > { %v1508_v9 = vpop.f32.mrf.mxu2 }
 0x38a   : > { %1070 = vmatmul.msk.f32.gmra.mxu1 %vm341_vm2, %v1508_v9 }
 0x391   : > { %v1512_v11 = vpop.f32.mrf.mxu2 }
 0x392   : > { %1071 = vmatmul.msk.f32.gmra.mxu1 %vm341_vm2, %v1512_v11 }
 0x3d7   : > { %v755_v16 = vpop.f32.mrf.mxu1 }
 0x3d8   : > { %v756_v17 = vadd.f32 %v1114_v55, %v755_v16 }
 0x3da   : > { %vm779_vm7 = vcmp.ge.f32.partialorder %v756_v17, 0.0  ;;  %v788_v18 = vmul.f32 %v1525_v15, %v756_v17 }
 0x3dc   : > { %v796_v42 = vsel %vm779_vm7, %v756_v17, %v788_v18  ;;  %vm1619_vm7 = vmmov %vm1612_vm3 }
 0x3dd   : > { %1072 = vmatmul.msk.f32.vlgmr.msra.gmra.mxu1 %vm1612_vm3, %v796_v42 }
 0x3df   : > { %v758_v19 = vpop.f32.mrf.mxu1 }
 0x3e0   : > { %v759_v20 = vadd.f32 %v1114_v55, %v758_v19 }
 0x3e2   : > { %vm780_vm9 = vcmp.ge.f32.partialorder %v759_v20, 0.0  ;;  %v789_v21 = vmul.f32 %v1525_v15, %v759_v20 }
 0x3e4   : > { %v797_v22 = vsel %vm780_vm9, %v759_v20, %v789_v21  ;;  %v1119_v21 = vld [vmem:[%s1163_s14 + $0x28] sm:$0xff] }
 0x3e5   : > { %1073 = vmatmul.msk.f32.vlgmr.msrb.gmra.mxu3 %vm1613_vm13, %v797_v22 }
 0x3e7   : > { %v761_v62 = vpop.f32.mrf.mxu1 }
 0x3e8   : > { %v762_v23 = vadd.f32 %v1114_v55, %v761_v62 }
 0x3ea   : > { %v790_v24 = vmul.f32 %v1525_v15, %v762_v23  ;;  %vm781_vm8 = vcmp.ge.f32.partialorder %v762_v23, 0.0 }
 0x3ec   : > { %v798_v28 = vsel %vm781_vm8, %v762_v23, %v790_v24 }
 0x3ed   : > { %1074 = vmatmul.msk.f32.gmra.mxu3 %vm1614_vm14, %v798_v28  ;;  %v1120_v28 = vld [vmem:[%s1163_s14 + $0x30] sm:$0xff] }
 0x3ef   : > { %v764_v52 = vpop.f32.mrf.mxu1 }
 0x3f0   : > { %v765_v25 = vadd.f32 %v1114_v55, %v764_v52 }
 0x3f2   : > { %v791_v27 = vmul.f32 %v1525_v15, %v765_v25  ;;  %vm782_vm5 = vcmp.ge.f32.partialorder %v765_v25, 0.0 }
 0x3f4   : > { %v799_v29 = vsel %vm782_vm5, %v765_v25, %v791_v27 }
 0x3f5   : > { %1075 = vmatmul.msk.f32.gmra.mxu3 %vm1615_vm15, %v799_v29 }
 0x3f7   : > { %v767_v31 = vpop.f32.mrf.mxu1 }
 0x3f8   : > { %v768_v32 = vadd.f32 %v1114_v55, %v767_v31 }
 0x3fa   : > { %v792_v33 = vmul.f32 %v1525_v15, %v768_v32  ;;  %vm783_vm10 = vcmp.ge.f32.partialorder %v768_v32, 0.0 }
 0x3fc   : > { %v800_v35 = vsel %vm783_vm10, %v768_v32, %v792_v33  ;;  %v1121_v32 = vld [vmem:[%s1163_s14 + $0x38] sm:$0xff] }
 0x3fd   : > { %1076 = vmatmul.msk.f32.gmra.mxu3 %vm1616_vm11, %v800_v35 }
 0x3ff   : > { %v770_v36 = vpop.f32.mrf.mxu1 }
 0x400   : > { %v771_v37 = vadd.f32 %v1114_v55, %v770_v36 }
 0x402   : > { %v793_v38 = vmul.f32 %v1525_v15, %v771_v37  ;;  %vm784_vm4 = vcmp.ge.f32.partialorder %v771_v37, 0.0 }
 0x404   : > { %v801_v39 = vsel %vm784_vm4, %v771_v37, %v793_v38 }
 0x405   : > { %1077 = vmatmul.msk.f32.gmra.mxu3 %vm1617_vm12, %v801_v39 }
 0x407   : > { %v773_v40 = vpop.f32.mrf.mxu1 }
 0x408   : > { %v774_v41 = vadd.f32 %v1114_v55, %v773_v40 }
 0x40a   : > { %v794_v44 = vmul.f32 %v1525_v15, %v774_v41  ;;  %vm785_vm1 = vcmp.ge.f32.partialorder %v774_v41, 0.0 }
 0x40c   : > { %v802_v45 = vsel %vm785_vm1, %v774_v41, %v794_v44 }
 0x40d   : > { %1078 = vmatmul.msk.f32.gmra.mxu3 %vm1618_vm6, %v802_v45 }
 0x40f   : > { %v776_v46 = vpop.f32.mrf.mxu1 }
 0x410   : > { %v777_v47 = vadd.f32 %v1114_v55, %v776_v46 }
 0x412   : > { %v795_v48 = vmul.f32 %v1525_v15, %v777_v47  ;;  %vm786_vm0 = vcmp.ge.f32.partialorder %v777_v47, 0.0 }
 0x414   : > { %v803_v49 = vsel %vm786_vm0, %v777_v47, %v795_v48 }
 0x415   : > { %1079 = vmatmul.msk.f32.gmra.mxu3 %vm1619_vm7, %v803_v49 }
 0x45a   : > { %v845_v57 = vpop.f32.mrf.mxu1 }
 0x468   : > { %v848_v50 = vpop.f32.mrf.mxu3 }
 0x470   : > { %v851_v51 = vpop.f32.mrf.mxu3 }
 0x478   : > { %v854_v53 = vpop.f32.mrf.mxu3 }
 0x480   : > { %v857_v54 = vpop.f32.mrf.mxu3 }
 0x488   : > { %v860_v1 = vpop.f32.mrf.mxu3 }
 0x490   : > { %v863_v0 = vpop.f32.mrf.mxu3 }
 0x498   : > { %v866_v4 = vpop.f32.mrf.mxu3 }
 0x499   : > { %878 = vmatpush.msrb.mxu0 %v866_v4 }
 0x49b   : > { %879 = vmatpush.msrb.mxu0 %v863_v0 }
 0x49d   : > { %880 = vmatpush.msrb.mxu0 %v860_v1 }
 0x49f   : > { %881 = vmatpush.msrb.mxu0 %v857_v54 }
 0x4a1   : > { %882 = vmatpush.msrb.mxu0 %v854_v53 }
 0x4a3   : > { %883 = vmatpush.msrb.mxu0 %v851_v51 }
 0x4a5   : > { %884 = vmatpush.msrb.mxu0 %v848_v50 }
 0x4a7   : > { %885 = vmatpush.msrb.mxu0 %v845_v57 }
 0x4a8   : > { %1080 = vmatmul.msk.f32.vlgmr.msrb.gmra.mxu0 %vm341_vm2, %v1475_v60 }
 0x4b0   : > { %1081 = vmatmul.msk.f32.gmra.mxu0 %vm341_vm2, %v1479_v61 }
 0x4b8   : > { %1082 = vmatmul.msk.f32.gmra.mxu0 %vm341_vm2, %v1483_v43 }
 0x4c0   : > { %1083 = vmatmul.msk.f32.gmra.mxu0 %vm341_vm2, %v1487_v63 }
 0x4c8   : > { %1084 = vmatmul.msk.f32.gmra.mxu0 %vm341_vm2, %v1500_v7 }
 0x4d0   : > { %1085 = vmatmul.msk.f32.gmra.mxu0 %vm341_vm2, %v1504_v30 }
 0x4d8   : > { %1086 = vmatmul.msk.f32.gmra.mxu0 %vm341_vm2, %v1508_v9 }
 0x4e0   : > { %1087 = vmatmul.msk.f32.gmra.mxu0 %vm341_vm2, %v1512_v11  ;;  %vm1620_vm2 = vmmov %vm1618_vm6 }
 0x4e1   : > { %vm1621_vm13 = vmmov %vm1620_vm2 }
 0x4e2   : > { %vm1622_vm14 = vmmov %vm1620_vm2 }
 0x4e3   : > { %vm1623_vm15 = vmmov %vm1620_vm2 }
 0x4e4   : > { %vm1624_vm11 = vmmov %vm1620_vm2 }
 0x4e5   : > { %vm1625_vm12 = vmmov %vm1620_vm2 }
 0x4e6   : > { %vm1626_vm6 = vmmov %vm1620_vm2 }
 0x4e7   : > { %vm1627_vm7 = vmmov %vm1620_vm2 }
 0x525   : > { %v887_v56 = vpop.f32.mrf.mxu0 }
 0x526   : > { %v888_v59 = vadd.f32 %v1116_v58, %v887_v56 }
 0x528   : > { %v911_v34 = vadd.f32 %v888_v59, %v1231_v14 }
 0x52a   : > { %vm919_vm3 = vcmp.ge.f32.partialorder %v911_v34, 0.0  ;;  %v927_v26 = vmul.f32 %v1525_v15, %v911_v34 }
 0x52c   : > { %v935_v60 = vsel %vm919_vm3, %v911_v34, %v927_v26 }
 0x52d   : > { %943 = vst.msk [vmem:[%s1568_s15] sm:$0xff] %vm1620_vm2, %v935_v60  ;;  %v890_v61 = vpop.f32.mrf.mxu0 }
 0x52e   : > { %v891_v43 = vadd.f32 %v1116_v58, %v890_v61 }
 0x530   : > { %v912_v63 = vadd.f32 %v891_v43, %v1221_v12 }
 0x532   : > { %vm920_vm9 = vcmp.ge.f32.partialorder %v912_v63, 0.0  ;;  %v928_v14 = vmul.f32 %v1525_v15, %v912_v63 }
 0x534   : > { %v936_v2 = vsel %vm920_vm9, %v912_v63, %v928_v14 }
 0x535   : > { %944 = vst.msk [vmem:[%s1568_s15 + $0x8] sm:$0xff] %vm1621_vm13, %v936_v2  ;;  %v893_v3 = vpop.f32.mrf.mxu0 }
 0x536   : > { %v894_v5 = vadd.f32 %v1116_v58, %v893_v3 }
 0x538   : > { %v913_v7 = vadd.f32 %v894_v5, %v1211_v10 }
 0x53a   : > { %vm921_vm8 = vcmp.ge.f32.partialorder %v913_v7, 0.0  ;;  %v929_v30 = vmul.f32 %v1525_v15, %v913_v7 }
 0x53c   : > { %v937_v9 = vsel %vm921_vm8, %v913_v7, %v929_v30 }
 0x53d   : > { %945 = vst.msk [vmem:[%s1568_s15 + $0x10] sm:$0xff] %vm1622_vm14, %v937_v9  ;;  %v896_v11 = vpop.f32.mrf.mxu0 }
 0x53e   : > { %v897_v12 = vadd.f32 %v1116_v58, %v896_v11 }
 0x540   : > { %v914_v13 = vadd.f32 %v897_v12, %v1201_v8 }
 0x542   : > { %vm922_vm5 = vcmp.ge.f32.partialorder %v914_v13, 0.0  ;;  %v930_v55 = vmul.f32 %v1525_v15, %v914_v13 }
 0x544   : > { %v938_v16 = vsel %vm922_vm5, %v914_v13, %v930_v55 }
 0x545   : > { %946 = vst.msk [vmem:[%s1568_s15 + $0x18] sm:$0xff] %vm1623_vm15, %v938_v16  ;;  %v899_v10 = vpop.f32.mrf.mxu0 }
 0x546   : > { %v900_v17 = vadd.f32 %v1116_v58, %v899_v10 }
 0x548   : > { %v915_v18 = vadd.f32 %v900_v17, %v1191_v6 }
 0x54a   : > { %vm923_vm10 = vcmp.ge.f32.partialorder %v915_v18, 0.0  ;;  %v931_v42 = vmul.f32 %v1525_v15, %v915_v18 }
 0x54c   : > { %v939_v19 = vsel %vm923_vm10, %v915_v18, %v931_v42 }
 0x54d   : > { %947 = vst.msk [vmem:[%s1568_s15 + $0x20] sm:$0xff] %vm1624_vm11, %v939_v19  ;;  %v902_v8 = vpop.f32.mrf.mxu0 }
 0x54e   : > { %v903_v20 = vadd.f32 %v1116_v58, %v902_v8 }
 0x550   : > { %v916_v22 = vadd.f32 %v1119_v21, %v903_v20 }
 0x552   : > { %vm924_vm4 = vcmp.ge.f32.partialorder %v916_v22, 0.0  ;;  %v932_v62 = vmul.f32 %v1525_v15, %v916_v22 }
 0x554   : > { %v940_v23 = vsel %vm924_vm4, %v916_v22, %v932_v62 }
 0x555   : > { %948 = vst.msk [vmem:[%s1568_s15 + $0x28] sm:$0xff] %vm1625_vm12, %v940_v23  ;;  %v905_v6 = vpop.f32.mrf.mxu0 }
 0x556   : > { %v906_v24 = vadd.f32 %v1116_v58, %v905_v6 }
 0x558   : > { %v917_v52 = vadd.f32 %v1120_v28, %v906_v24 }
 0x55a   : > { %vm925_vm1 = vcmp.ge.f32.partialorder %v917_v52, 0.0  ;;  %v933_v25 = vmul.f32 %v1525_v15, %v917_v52 }
 0x55c   : > { %v941_v27 = vsel %vm925_vm1, %v917_v52, %v933_v25 }
 0x55d   : > { %949 = vst.msk [vmem:[%s1568_s15 + $0x30] sm:$0xff] %vm1626_vm6, %v941_v27  ;;  %v908_v29 = vpop.f32.mrf.mxu0 }
 0x55e   : > { %v909_v31 = vadd.f32 %v1116_v58, %v908_v29 }
 0x560   : > { %v918_v33 = vadd.f32 %v1121_v32, %v909_v31 }
 0x562   : > { %vm926_vm0 = vcmp.ge.f32.partialorder %v918_v33, 0.0  ;;  %v934_v35 = vmul.f32 %v1525_v15, %v918_v33 }
 0x564   : > { %v942_v36 = vsel %vm926_vm0, %v918_v33, %v934_v35 }
 0x565   : > { %950 = vst.msk [vmem:[%s1568_s15 + $0x38] sm:$0xff] %vm1627_vm7, %v942_v36 }
 0x566 PF: > { %s12_s9 = sadd.s32 1, %s1128_s9  }
 0x567   : > { %p9_p4 = scmp.ge.s32.totalorder %s12_s9, 6  }
 0x569   :  { %11 = sbr.rel (!%p9_p4) target bundleno = 1 (0x1), region = 58 }

</bundles_post_ra>
